<compile_context>
chip_gen: v6e
topology: v6e:2x2x1
jax: 0.10.0
libtpu: 0.0.40
codegen_flags: <defaults>
</compile_context>

<pallas_src>
import jax
import jax.numpy as jnp
from jax.experimental import pallas as pl
from jax.experimental.pallas import tpu as pltpu


# ----------------------------------------------------------------------------
# Pallas kernel: one grid step == `Bt` batch elements, channel-major layout.
#   s_ref   : (Bt, C, 3*HW)  lane-stacked [X | OB | OD]
#   w_in    : (5*IC, C)      packed [wt; wp; wg_x; wg_b; wg_d]
#   w5      : (C, 5*IC)      packed [W_x | s2*W_b | s1*W_d | s1*W_xb | s2*W_xd]
#   w_out   : (C, C)         out_conv weight
#   bias    : (3*IC + 2*C, 1) packed [bg_x; bg_b; bg_d; b5(fused W/bn bias); b_out]
#   o_ref   : (Bt, C, HW)
# ----------------------------------------------------------------------------
def _cross_nonlocal_kernel(s_ref, w_in_ref, w5_ref, w_out_ref, bias_ref, o_ref):
    Bt = s_ref.shape[0]
    C = o_ref.shape[1]
    HW = o_ref.shape[2]
    IC = w_in_ref.shape[0] // 5

    w_in = w_in_ref[...].astype(jnp.float32)     # (5IC, C)
    w5 = w5_ref[...].astype(jnp.float32)         # (C, 5IC)
    w_out = w_out_ref[...].astype(jnp.float32)   # (C, C)
    bias = bias_ref[...].astype(jnp.float32)     # (3IC + 2C, 1)
    bg = bias[0:3 * IC]                          # (3IC, 1)
    b5 = bias[3 * IC:3 * IC + C]                 # (C, 1)
    b_out = bias[3 * IC + C:3 * IC + 2 * C]      # (C, 1)

    # Bt is small (<= 8) and per-iteration live values are a few dozen vregs,
    # so a static unrolled loop over the batch block is fine.
    for b in range(Bt):
        S = s_ref[b].astype(jnp.float32)         # (C, 3HW) = [X | OB | OD]

        # One fused matmul for t, p (shared weights) and g_x/g_b/g_d of all
        # three streams: (5IC, C) @ (C, 3HW).
        P = jnp.dot(w_in, S, preferred_element_type=jnp.float32)   # (5IC, 3HW)

        def stream(idx):
            lo = idx * HW
            t = jnp.maximum(P[0:IC, lo:lo + HW], 0.0)               # relu(t)
            p = jnp.maximum(P[IC:2 * IC, lo:lo + HW], 0.0)          # relu(p)
            g = (P[(2 + idx) * IC:(3 + idx) * IC, lo:lo + HW]
                 + bg[idx * IC:(idx + 1) * IC])                     # (IC, HW)
            # degree d[i] = sum_j 0.5*(t_i.p_j + p_i.t_j)
            #            = 0.5*(t_i . sum_j p_j + p_i . sum_j t_j)
            psum = jnp.sum(p, axis=1, keepdims=True)                # (IC, 1)
            tsum = jnp.sum(t, axis=1, keepdims=True)                # (IC, 1)
            d = 0.5 * (jnp.sum(t * psum, axis=0, keepdims=True)
                       + jnp.sum(p * tsum, axis=0, keepdims=True))  # (1, HW)
            nz = d != 0.0
            dinv = jnp.where(nz, jax.lax.rsqrt(jnp.where(nz, d, 1.0)), 0.0)
            return t, p, g, dinv

        t_x, p_x, g_x, di_x = stream(0)
        t_b, p_b, g_b, di_b = stream(1)
        t_d, p_d, g_d, di_d = stream(2)

        def aggregate(t, p, dinv, g):
            # channel-major (f @ g)^T with f = D^{-1/2} (A + A^T)/2 D^{-1/2},
            # A = t^T p, never materializing the (HW, HW) attention:
            #   0.5 * dinv * ( (g*dinv) t^T p + (g*dinv) p^T t )
            gd = g * dinv                                           # (IC, HW)
            m1 = jax.lax.dot_general(gd, t, (((1,), (1,)), ((), ())),
                                     preferred_element_type=jnp.float32)  # (IC, IC)
            m2 = jax.lax.dot_general(gd, p, (((1,), (1,)), ((), ())),
                                     preferred_element_type=jnp.float32)  # (IC, IC)
            y = (jnp.dot(m1, p, preferred_element_type=jnp.float32)
                 + jnp.dot(m2, t, preferred_element_type=jnp.float32))    # (IC, HW)
            return 0.5 * y * dinv

        x_self = aggregate(t_x, p_x, di_x, g_x)    # f_x @ g_x
        ob_self = aggregate(t_b, p_b, di_b, g_b)   # f_b @ g_b
        od_self = aggregate(t_d, p_d, di_d, g_d)   # f_d @ g_d
        x_ob = aggregate(t_b, p_b, di_b, g_x)      # f_b @ g_x
        x_od = aggregate(t_d, p_d, di_d, g_x)      # f_d @ g_x

        # Five W_* projections + bn1 + bn2 fused into one matmul (BN scales
        # were folded into w5 on the host).
        Y = jnp.concatenate([x_self, ob_self, od_self, x_ob, x_od], axis=0)  # (5IC, HW)
        pre = jnp.dot(w5, Y, preferred_element_type=jnp.float32) + b5        # (C, HW)
        out = jnp.dot(w_out, pre, preferred_element_type=jnp.float32) + b_out
        o_ref[b] = (out + S[:, 0:HW]).astype(o_ref.dtype)                    # residual +x


# ----------------------------------------------------------------------------
# Host-side parameter packing (inference-form BN fold + weight concatenation).
# ----------------------------------------------------------------------------
_BN_EPS = 1e-5


def _pack_params(p):
    IC, C = p["wt"].shape
    w_in = jnp.concatenate(
        [p["wt"], p["wp"], p["wg"][0], p["wg"][1], p["wg"][2]], axis=0)      # (5IC, C)

    s = p["bn_gamma"] / jnp.sqrt(p["bn_var"] + _BN_EPS)                      # (2, C)
    h = p["bn_beta"] - p["bn_mean"] * s                                      # (2, C)
    s1, h1, s2, h2 = s[0], h[0], s[1], h[1]

    Wx, Wb, Wd, Wxb, Wxd = (p["wW"][i] for i in range(5))                    # (C, IC)
    bx, bb, bd, bxb, bxd = (p["bW"][i] for i in range(5))                    # (C,)

    # out_pre = bn1(Wd@od + bd + Wxb@xob + bxb) + bn2(Wb@ob + bb + Wxd@xod + bxd)
    #           + Wx@xself + bx
    w5 = jnp.concatenate(
        [Wx, s2[:, None] * Wb, s1[:, None] * Wd,
         s1[:, None] * Wxb, s2[:, None] * Wxd], axis=1)                      # (C, 5IC)
    b5 = bx + s1 * (bd + bxb) + h1 + s2 * (bb + bxd) + h2                    # (C,)

    bias_pack = jnp.concatenate(
        [p["bg"].reshape(-1), b5, p["bout"]], axis=0)[:, None]               # (3IC+2C, 1)
    return w_in, w5, p["wout"], bias_pack


def _pick_batch_block(B, cap=8):
    # Largest divisor of B (<= cap) that still leaves >= 2 grid steps so v7x
    # megacore can shard the "parallel" batch axis; falls back to 1.
    best = 1
    for cand in range(1, min(B, cap) + 1):
        if B % cand == 0 and B // cand >= 2:
            best = cand
    return best


# ----------------------------------------------------------------------------
# Host wrapper: NCHW -> (B, C, HW) is a pure reshape (no transposes), the
# three streams are lane-stacked into one pipelined data input.
# ----------------------------------------------------------------------------
def cross_nonlocal_block(x, ob, od, params, batch_block=None):
    B, C, H, W = x.shape
    assert ob.shape == od.shape == (B, C, H, W)
    assert (H, W) == (16, 16), "UpsamplingBilinear2d((16,16)) is identity only at 16x16"
    # TODO(synk): general bilinear upsample to (16,16) for other spatial sizes.
    HW = H * W

    Bt = batch_block if batch_block is not None else _pick_batch_block(B)
    assert B % Bt == 0

    # (B, C, 3*HW): [X | OB | OD] stacked along the lane (HW) axis.
    s_all = jnp.concatenate(
        [x.reshape(B, C, HW), ob.reshape(B, C, HW), od.reshape(B, C, HW)], axis=-1)

    w_in, w5, w_out, bias_pack = _pack_params(params)

    data_spec = pl.BlockSpec((Bt, C, 3 * HW), lambda i: (i, 0, 0))
    out_spec = pl.BlockSpec((Bt, C, HW), lambda i: (i, 0, 0))

    def const_spec(shape):
        nd = len(shape)
        return pl.BlockSpec(shape, lambda i, _nd=nd: (0,) * _nd)

    out = pl.pallas_call(
        _cross_nonlocal_kernel,
        out_shape=jax.ShapeDtypeStruct((B, C, HW), x.dtype),
        grid_spec=pltpu.PrefetchScalarGridSpec(
            num_scalar_prefetch=0,
            grid=(B // Bt,),
            in_specs=[
                data_spec,
                const_spec(w_in.shape),
                const_spec(w5.shape),
                const_spec(w_out.shape),
                const_spec(bias_pack.shape),
            ],
            out_specs=out_spec,
        ),
        compiler_params=pltpu.CompilerParams(dimension_semantics=("parallel",)),
    )(s_all, w_in, w5, w_out, bias_pack)

    return out.reshape(B, C, H, W)


# ----------------------------------------------------------------------------
# Deterministic parameter init (shapes follow the PyTorch module __init__,
# 1x1 conv weights stored as (C_out, C_in)).
# ----------------------------------------------------------------------------
def init_params(key, C, IC):
    ks = jax.random.split(key, 12)
    s = 0.1
    return dict(
        wt=jax.random.normal(ks[0], (IC, C), jnp.float32) * s,       # self.t (no bias)
        wp=jax.random.normal(ks[1], (IC, C), jnp.float32) * s,       # self.p (no bias)
        wg=jax.random.normal(ks[2], (3, IC, C), jnp.float32) * s,    # g_x, g_b, g_d
        bg=jax.random.normal(ks[3], (3, IC), jnp.float32) * s,
        wW=jax.random.normal(ks[4], (5, C, IC), jnp.float32) * s,    # W_x,W_b,W_d,W_xb,W_xd
        bW=jax.random.normal(ks[5], (5, C), jnp.float32) * s,
        bn_gamma=1.0 + 0.1 * jax.random.normal(ks[6], (2, C), jnp.float32),
        bn_beta=0.1 * jax.random.normal(ks[7], (2, C), jnp.float32),
        bn_mean=0.1 * jax.random.normal(ks[8], (2, C), jnp.float32),
        bn_var=1.0 + 0.1 * jnp.abs(jax.random.normal(ks[9], (2, C), jnp.float32)),
        wout=jax.random.normal(ks[10], (C, C), jnp.float32) * s,     # out_conv
        bout=jax.random.normal(ks[11], (C,), jnp.float32) * s,
    )


# ----------------------------------------------------------------------------
# Pure-JAX reference mirroring the PyTorch forward (materializes the (HW,HW)
# attention, explicit bn1/bn2) for correctness checking.
# ----------------------------------------------------------------------------
def reference(x, ob, od, p):
    B, C, H, W = x.shape
    HW = H * W
    X, OB, OD = (a.reshape(B, C, HW) for a in (x, ob, od))
    wt, wp = p["wt"], p["wp"]

    def dotk(inp):                                       # inp: (B, C, HW)
        t = jax.nn.relu(jnp.einsum("kc,bcn->bkn", wt, inp))
        q = jax.nn.relu(jnp.einsum("kc,bcn->bkn", wp, inp))
        att = jnp.einsum("bki,bkj->bij", t, q)           # (B, HW, HW)
        att = 0.5 * (att + jnp.swapaxes(att, 1, 2))
        d = att.sum(-1)
        d = jnp.where(d != 0, jnp.sqrt(1.0 / jnp.where(d != 0, d, 1.0)), 0.0)
        return att * d[:, None, :] * d[:, :, None]

    def gproj(inp, i):
        return jnp.einsum("kc,bcn->bkn", p["wg"][i], inp) + p["bg"][i][None, :, None]

    def agg(f, g):                                       # (B,HW,HW), (B,IC,HW) -> (B,IC,HW)
        return jnp.einsum("bij,bkj->bki", f, g)

    def wproj(y, i):
        return jnp.einsum("ck,bkn->bcn", p["wW"][i], y) + p["bW"][i][None, :, None]

    def bn(z, i):
        sc = p["bn_gamma"][i] / jnp.sqrt(p["bn_var"][i] + _BN_EPS)
        sh = p["bn_beta"][i] - p["bn_mean"][i] * sc
        return z * sc[None, :, None] + sh[None, :, None]

    f_x, f_b, f_d = dotk(X), dotk(OB), dotk(OD)
    g_x, g_b, g_d = gproj(X, 0), gproj(OB, 1), gproj(OD, 2)

    x_self = wproj(agg(f_x, g_x), 0)
    ob_self = wproj(agg(f_b, g_b), 1)
    od_self = wproj(agg(f_d, g_d), 2)
    x_ob = wproj(agg(f_b, g_x), 3)
    x_od = wproj(agg(f_d, g_x), 4)

    out = bn(od_self + x_ob, 0) + bn(ob_self + x_od, 1) + x_self
    out = jnp.einsum("ck,bkn->bcn", p["wout"], out) + p["bout"][None, :, None]
    out = out + X
    return out.reshape(B, C, H, W)


if __name__ == "__main__":
    B, C, IC, H, W = 2, 4, 8, 16, 16
    key = jax.random.PRNGKey(0)
    kx, kb, kd, kp = jax.random.split(key, 4)
    x = jax.random.normal(kx, (B, C, H, W), jnp.float32)
    ob = jax.random.normal(kb, (B, C, H, W), jnp.float32)
    od = jax.random.normal(kd, (B, C, H, W), jnp.float32)
    params = init_params(kp, C, IC)

    out = cross_nonlocal_block(x, ob, od, params)
    out = jax.block_until_ready(out)

    ref = reference(x, ob, od, params)
    assert out.shape == (B, C, H, W)
    max_err = float(jnp.max(jnp.abs(out - ref)))
    # Tolerance covers f32 re-association from the algebraic attention fold /
    # BN-into-weight fold (all math stays f32).
    assert jnp.allclose(out, ref, atol=1e-3, rtol=1e-3), f"mismatch vs reference (max abs err {max_err})"
    print("KERNEL_OK")
</pallas_src>

<mosaic_0001>
module attributes {stable_mosaic.version = 11 : i64} {
  func.func @_cross_nonlocal_kernel(%arg0: i32, %arg1: memref<1x4x768xf32, #tpu.memory_space<vmem>>, %arg2: memref<40x4xf32, #tpu.memory_space<vmem>>, %arg3: memref<4x40xf32, #tpu.memory_space<vmem>>, %arg4: memref<4x4xf32, #tpu.memory_space<vmem>>, %arg5: memref<32x1xf32, #tpu.memory_space<vmem>>, %arg6: memref<1x4x256xf32, #tpu.memory_space<vmem>>) attributes {dimension_semantics = [#tpu.dimension_semantics<parallel>], iteration_bounds = array<i64: 2>, scalar_prefetch = 0 : i64, scratch_operands = 0 : i64, tpu.core_type = #tpu.core_type<tc>, window_params = [{transform_indices = @transform_0, window_bounds = array<i64: 1, 4, 768>}, {pipeline_mode = #tpu.pipeline_mode<synchronous>, transform_indices = @transform_1, window_bounds = array<i64: 40, 4>}, {pipeline_mode = #tpu.pipeline_mode<synchronous>, transform_indices = @transform_2, window_bounds = array<i64: 4, 40>}, {pipeline_mode = #tpu.pipeline_mode<synchronous>, transform_indices = @transform_3, window_bounds = array<i64: 4, 4>}, {pipeline_mode = #tpu.pipeline_mode<synchronous>, transform_indices = @transform_4, window_bounds = array<i64: 32, 1>}, {transform_indices = @transform_5, window_bounds = array<i64: 1, 4, 256>}]} {
    %c0 = arith.constant 0 : index
    %c0_0 = arith.constant 0 : index
    %0 = vector.load %arg2[%c0, %c0_0] : memref<40x4xf32, #tpu.memory_space<vmem>>, vector<40x4xf32>
    %c0_1 = arith.constant 0 : index
    %c0_2 = arith.constant 0 : index
    %1 = vector.load %arg3[%c0_1, %c0_2] : memref<4x40xf32, #tpu.memory_space<vmem>>, vector<4x40xf32>
    %c0_3 = arith.constant 0 : index
    %c0_4 = arith.constant 0 : index
    %2 = vector.load %arg4[%c0_3, %c0_4] : memref<4x4xf32, #tpu.memory_space<vmem>>, vector<4x4xf32>
    %c0_5 = arith.constant 0 : index
    %c0_6 = arith.constant 0 : index
    %3 = vector.load %arg5[%c0_5, %c0_6] : memref<32x1xf32, #tpu.memory_space<vmem>>, vector<32x1xf32>
    %4 = vector.extract_strided_slice %3 {offsets = [0, 0], sizes = [24, 1], strides = [1, 1]} : vector<32x1xf32> to vector<24x1xf32>
    %5 = vector.extract_strided_slice %3 {offsets = [24, 0], sizes = [4, 1], strides = [1, 1]} : vector<32x1xf32> to vector<4x1xf32>
    %6 = vector.extract_strided_slice %3 {offsets = [28, 0], sizes = [4, 1], strides = [1, 1]} : vector<32x1xf32> to vector<4x1xf32>
    %c0_7 = arith.constant 0 : index
    %c0_8 = arith.constant 0 : index
    %c0_9 = arith.constant 0 : index
    %7 = vector.load %arg1[%c0_7, %c0_8, %c0_9] : memref<1x4x768xf32, #tpu.memory_space<vmem>>, vector<1x4x768xf32>
    %8 = vector.shape_cast %7 : vector<1x4x768xf32> to vector<4x768xf32>
    %cst = arith.constant dense<0.000000e+00> : vector<40x768xf32>
    %9 = tpu.matmul %0, %8, %cst {dimension_numbers = #tpu.dot_dimension_numbers<[1], [0], [0], [1], [0, 0, 1, 1], [], []>} : vector<40x4xf32>, vector<4x768xf32>, vector<40x768xf32> -> vector<40x768xf32>
    %10 = vector.extract_strided_slice %9 {offsets = [0, 0], sizes = [8, 256], strides = [1, 1]} : vector<40x768xf32> to vector<8x256xf32>
    %cst_10 = arith.constant 0.000000e+00 : f32
    %11 = vector.broadcast %cst_10 : f32 to vector<8x256xf32>
    %12 = arith.maximumf %10, %11 : vector<8x256xf32>
    %13 = vector.extract_strided_slice %9 {offsets = [8, 0], sizes = [8, 256], strides = [1, 1]} : vector<40x768xf32> to vector<8x256xf32>
    %cst_11 = arith.constant 0.000000e+00 : f32
    %14 = vector.broadcast %cst_11 : f32 to vector<8x256xf32>
    %15 = arith.maximumf %13, %14 : vector<8x256xf32>
    %16 = vector.extract_strided_slice %9 {offsets = [16, 0], sizes = [8, 256], strides = [1, 1]} : vector<40x768xf32> to vector<8x256xf32>
    %17 = vector.extract_strided_slice %4 {offsets = [0, 0], sizes = [8, 1], strides = [1, 1]} : vector<24x1xf32> to vector<8x1xf32>
    %18 = vector.broadcast %17 : vector<8x1xf32> to vector<8x256xf32>
    %19 = arith.addf %16, %18 : vector<8x256xf32>
    %cst_12 = arith.constant dense<0.000000e+00> : vector<8xf32>
    %20 = vector.multi_reduction <add>, %15, %cst_12 [1] : vector<8x256xf32> to vector<8xf32>
    %21 = vector.shape_cast %20 : vector<8xf32> to vector<8x1xf32>
    %cst_13 = arith.constant dense<0.000000e+00> : vector<8xf32>
    %22 = vector.multi_reduction <add>, %12, %cst_13 [1] : vector<8x256xf32> to vector<8xf32>
    %23 = vector.shape_cast %22 : vector<8xf32> to vector<8x1xf32>
    %24 = vector.broadcast %21 : vector<8x1xf32> to vector<8x256xf32>
    %25 = arith.mulf %12, %24 : vector<8x256xf32>
    %cst_14 = arith.constant dense<0.000000e+00> : vector<256xf32>
    %26 = vector.multi_reduction <add>, %25, %cst_14 [0] : vector<8x256xf32> to vector<256xf32>
    %27 = vector.shape_cast %26 : vector<256xf32> to vector<1x256xf32>
    %28 = vector.broadcast %23 : vector<8x1xf32> to vector<8x256xf32>
    %29 = arith.mulf %15, %28 : vector<8x256xf32>
    %cst_15 = arith.constant dense<0.000000e+00> : vector<256xf32>
    %30 = vector.multi_reduction <add>, %29, %cst_15 [0] : vector<8x256xf32> to vector<256xf32>
    %31 = vector.shape_cast %30 : vector<256xf32> to vector<1x256xf32>
    %32 = arith.addf %27, %31 : vector<1x256xf32>
    %cst_16 = arith.constant 5.000000e-01 : f32
    %33 = vector.broadcast %cst_16 : f32 to vector<1x256xf32>
    %34 = arith.mulf %33, %32 : vector<1x256xf32>
    %cst_17 = arith.constant 0.000000e+00 : f32
    %35 = vector.broadcast %cst_17 : f32 to vector<1x256xf32>
    %36 = arith.cmpf one, %34, %35 : vector<1x256xf32>
    %cst_18 = arith.constant 1.000000e+00 : f32
    %37 = vector.broadcast %cst_18 : f32 to vector<1x256xf32>
    %38 = arith.select %36, %34, %37 : vector<1x256xi1>, vector<1x256xf32>
    %39 = math.rsqrt %38 : vector<1x256xf32>
    %cst_19 = arith.constant 0.000000e+00 : f32
    %40 = vector.broadcast %cst_19 : f32 to vector<1x256xf32>
    %41 = arith.select %36, %39, %40 : vector<1x256xi1>, vector<1x256xf32>
    %42 = vector.extract_strided_slice %9 {offsets = [0, 256], sizes = [8, 256], strides = [1, 1]} : vector<40x768xf32> to vector<8x256xf32>
    %cst_20 = arith.constant 0.000000e+00 : f32
    %43 = vector.broadcast %cst_20 : f32 to vector<8x256xf32>
    %44 = arith.maximumf %42, %43 : vector<8x256xf32>
    %45 = vector.extract_strided_slice %9 {offsets = [8, 256], sizes = [8, 256], strides = [1, 1]} : vector<40x768xf32> to vector<8x256xf32>
    %cst_21 = arith.constant 0.000000e+00 : f32
    %46 = vector.broadcast %cst_21 : f32 to vector<8x256xf32>
    %47 = arith.maximumf %45, %46 : vector<8x256xf32>
    %48 = vector.extract_strided_slice %9 {offsets = [24, 256], sizes = [8, 256], strides = [1, 1]} : vector<40x768xf32> to vector<8x256xf32>
    %49 = vector.extract_strided_slice %4 {offsets = [8, 0], sizes = [8, 1], strides = [1, 1]} : vector<24x1xf32> to vector<8x1xf32>
    %50 = vector.broadcast %49 : vector<8x1xf32> to vector<8x256xf32>
    %51 = arith.addf %48, %50 : vector<8x256xf32>
    %cst_22 = arith.constant dense<0.000000e+00> : vector<8xf32>
    %52 = vector.multi_reduction <add>, %47, %cst_22 [1] : vector<8x256xf32> to vector<8xf32>
    %53 = vector.shape_cast %52 : vector<8xf32> to vector<8x1xf32>
    %cst_23 = arith.constant dense<0.000000e+00> : vector<8xf32>
    %54 = vector.multi_reduction <add>, %44, %cst_23 [1] : vector<8x256xf32> to vector<8xf32>
    %55 = vector.shape_cast %54 : vector<8xf32> to vector<8x1xf32>
    %56 = vector.broadcast %53 : vector<8x1xf32> to vector<8x256xf32>
    %57 = arith.mulf %44, %56 : vector<8x256xf32>
    %cst_24 = arith.constant dense<0.000000e+00> : vector<256xf32>
    %58 = vector.multi_reduction <add>, %57, %cst_24 [0] : vector<8x256xf32> to vector<256xf32>
    %59 = vector.shape_cast %58 : vector<256xf32> to vector<1x256xf32>
    %60 = vector.broadcast %55 : vector<8x1xf32> to vector<8x256xf32>
    %61 = arith.mulf %47, %60 : vector<8x256xf32>
    %cst_25 = arith.constant dense<0.000000e+00> : vector<256xf32>
    %62 = vector.multi_reduction <add>, %61, %cst_25 [0] : vector<8x256xf32> to vector<256xf32>
    %63 = vector.shape_cast %62 : vector<256xf32> to vector<1x256xf32>
    %64 = arith.addf %59, %63 : vector<1x256xf32>
    %cst_26 = arith.constant 5.000000e-01 : f32
    %65 = vector.broadcast %cst_26 : f32 to vector<1x256xf32>
    %66 = arith.mulf %65, %64 : vector<1x256xf32>
    %cst_27 = arith.constant 0.000000e+00 : f32
    %67 = vector.broadcast %cst_27 : f32 to vector<1x256xf32>
    %68 = arith.cmpf one, %66, %67 : vector<1x256xf32>
    %cst_28 = arith.constant 1.000000e+00 : f32
    %69 = vector.broadcast %cst_28 : f32 to vector<1x256xf32>
    %70 = arith.select %68, %66, %69 : vector<1x256xi1>, vector<1x256xf32>
    %71 = math.rsqrt %70 : vector<1x256xf32>
    %cst_29 = arith.constant 0.000000e+00 : f32
    %72 = vector.broadcast %cst_29 : f32 to vector<1x256xf32>
    %73 = arith.select %68, %71, %72 : vector<1x256xi1>, vector<1x256xf32>
    %74 = vector.extract_strided_slice %9 {offsets = [0, 512], sizes = [8, 256], strides = [1, 1]} : vector<40x768xf32> to vector<8x256xf32>
    %cst_30 = arith.constant 0.000000e+00 : f32
    %75 = vector.broadcast %cst_30 : f32 to vector<8x256xf32>
    %76 = arith.maximumf %74, %75 : vector<8x256xf32>
    %77 = vector.extract_strided_slice %9 {offsets = [8, 512], sizes = [8, 256], strides = [1, 1]} : vector<40x768xf32> to vector<8x256xf32>
    %cst_31 = arith.constant 0.000000e+00 : f32
    %78 = vector.broadcast %cst_31 : f32 to vector<8x256xf32>
    %79 = arith.maximumf %77, %78 : vector<8x256xf32>
    %80 = vector.extract_strided_slice %9 {offsets = [32, 512], sizes = [8, 256], strides = [1, 1]} : vector<40x768xf32> to vector<8x256xf32>
    %81 = vector.extract_strided_slice %4 {offsets = [16, 0], sizes = [8, 1], strides = [1, 1]} : vector<24x1xf32> to vector<8x1xf32>
    %82 = vector.broadcast %81 : vector<8x1xf32> to vector<8x256xf32>
    %83 = arith.addf %80, %82 : vector<8x256xf32>
    %cst_32 = arith.constant dense<0.000000e+00> : vector<8xf32>
    %84 = vector.multi_reduction <add>, %79, %cst_32 [1] : vector<8x256xf32> to vector<8xf32>
    %85 = vector.shape_cast %84 : vector<8xf32> to vector<8x1xf32>
    %cst_33 = arith.constant dense<0.000000e+00> : vector<8xf32>
    %86 = vector.multi_reduction <add>, %76, %cst_33 [1] : vector<8x256xf32> to vector<8xf32>
    %87 = vector.shape_cast %86 : vector<8xf32> to vector<8x1xf32>
    %88 = vector.broadcast %85 : vector<8x1xf32> to vector<8x256xf32>
    %89 = arith.mulf %76, %88 : vector<8x256xf32>
    %cst_34 = arith.constant dense<0.000000e+00> : vector<256xf32>
    %90 = vector.multi_reduction <add>, %89, %cst_34 [0] : vector<8x256xf32> to vector<256xf32>
    %91 = vector.shape_cast %90 : vector<256xf32> to vector<1x256xf32>
    %92 = vector.broadcast %87 : vector<8x1xf32> to vector<8x256xf32>
    %93 = arith.mulf %79, %92 : vector<8x256xf32>
    %cst_35 = arith.constant dense<0.000000e+00> : vector<256xf32>
    %94 = vector.multi_reduction <add>, %93, %cst_35 [0] : vector<8x256xf32> to vector<256xf32>
    %95 = vector.shape_cast %94 : vector<256xf32> to vector<1x256xf32>
    %96 = arith.addf %91, %95 : vector<1x256xf32>
    %cst_36 = arith.constant 5.000000e-01 : f32
    %97 = vector.broadcast %cst_36 : f32 to vector<1x256xf32>
    %98 = arith.mulf %97, %96 : vector<1x256xf32>
    %cst_37 = arith.constant 0.000000e+00 : f32
    %99 = vector.broadcast %cst_37 : f32 to vector<1x256xf32>
    %100 = arith.cmpf one, %98, %99 : vector<1x256xf32>
    %cst_38 = arith.constant 1.000000e+00 : f32
    %101 = vector.broadcast %cst_38 : f32 to vector<1x256xf32>
    %102 = arith.select %100, %98, %101 : vector<1x256xi1>, vector<1x256xf32>
    %103 = math.rsqrt %102 : vector<1x256xf32>
    %cst_39 = arith.constant 0.000000e+00 : f32
    %104 = vector.broadcast %cst_39 : f32 to vector<1x256xf32>
    %105 = arith.select %100, %103, %104 : vector<1x256xi1>, vector<1x256xf32>
    %106 = vector.broadcast %41 : vector<1x256xf32> to vector<8x256xf32>
    %107 = arith.mulf %19, %106 : vector<8x256xf32>
    %cst_40 = arith.constant dense<0.000000e+00> : vector<8x8xf32>
    %108 = tpu.matmul %107, %12, %cst_40 {dimension_numbers = #tpu.dot_dimension_numbers<[1], [1], [0], [0], [0, 0, 1, 0], [], []>} : vector<8x256xf32>, vector<8x256xf32>, vector<8x8xf32> -> vector<8x8xf32>
    %cst_41 = arith.constant dense<0.000000e+00> : vector<8x8xf32>
    %109 = tpu.matmul %107, %15, %cst_41 {dimension_numbers = #tpu.dot_dimension_numbers<[1], [1], [0], [0], [0, 0, 1, 0], [], []>} : vector<8x256xf32>, vector<8x256xf32>, vector<8x8xf32> -> vector<8x8xf32>
    %cst_42 = arith.constant dense<0.000000e+00> : vector<8x256xf32>
    %110 = tpu.matmul %108, %15, %cst_42 {dimension_numbers = #tpu.dot_dimension_numbers<[1], [0], [0], [1], [0, 0, 1, 1], [], []>} : vector<8x8xf32>, vector<8x256xf32>, vector<8x256xf32> -> vector<8x256xf32>
    %cst_43 = arith.constant dense<0.000000e+00> : vector<8x256xf32>
    %111 = tpu.matmul %109, %12, %cst_43 {dimension_numbers = #tpu.dot_dimension_numbers<[1], [0], [0], [1], [0, 0, 1, 1], [], []>} : vector<8x8xf32>, vector<8x256xf32>, vector<8x256xf32> -> vector<8x256xf32>
    %112 = arith.addf %110, %111 : vector<8x256xf32>
    %cst_44 = arith.constant 5.000000e-01 : f32
    %113 = vector.broadcast %cst_44 : f32 to vector<8x256xf32>
    %114 = arith.mulf %113, %112 : vector<8x256xf32>
    %115 = vector.broadcast %41 : vector<1x256xf32> to vector<8x256xf32>
    %116 = arith.mulf %114, %115 : vector<8x256xf32>
    %117 = vector.broadcast %73 : vector<1x256xf32> to vector<8x256xf32>
    %118 = arith.mulf %51, %117 : vector<8x256xf32>
    %cst_45 = arith.constant dense<0.000000e+00> : vector<8x8xf32>
    %119 = tpu.matmul %118, %44, %cst_45 {dimension_numbers = #tpu.dot_dimension_numbers<[1], [1], [0], [0], [0, 0, 1, 0], [], []>} : vector<8x256xf32>, vector<8x256xf32>, vector<8x8xf32> -> vector<8x8xf32>
    %cst_46 = arith.constant dense<0.000000e+00> : vector<8x8xf32>
    %120 = tpu.matmul %118, %47, %cst_46 {dimension_numbers = #tpu.dot_dimension_numbers<[1], [1], [0], [0], [0, 0, 1, 0], [], []>} : vector<8x256xf32>, vector<8x256xf32>, vector<8x8xf32> -> vector<8x8xf32>
    %cst_47 = arith.constant dense<0.000000e+00> : vector<8x256xf32>
    %121 = tpu.matmul %119, %47, %cst_47 {dimension_numbers = #tpu.dot_dimension_numbers<[1], [0], [0], [1], [0, 0, 1, 1], [], []>} : vector<8x8xf32>, vector<8x256xf32>, vector<8x256xf32> -> vector<8x256xf32>
    %cst_48 = arith.constant dense<0.000000e+00> : vector<8x256xf32>
    %122 = tpu.matmul %120, %44, %cst_48 {dimension_numbers = #tpu.dot_dimension_numbers<[1], [0], [0], [1], [0, 0, 1, 1], [], []>} : vector<8x8xf32>, vector<8x256xf32>, vector<8x256xf32> -> vector<8x256xf32>
    %123 = arith.addf %121, %122 : vector<8x256xf32>
    %cst_49 = arith.constant 5.000000e-01 : f32
    %124 = vector.broadcast %cst_49 : f32 to vector<8x256xf32>
    %125 = arith.mulf %124, %123 : vector<8x256xf32>
    %126 = vector.broadcast %73 : vector<1x256xf32> to vector<8x256xf32>
    %127 = arith.mulf %125, %126 : vector<8x256xf32>
    %128 = vector.broadcast %105 : vector<1x256xf32> to vector<8x256xf32>
    %129 = arith.mulf %83, %128 : vector<8x256xf32>
    %cst_50 = arith.constant dense<0.000000e+00> : vector<8x8xf32>
    %130 = tpu.matmul %129, %76, %cst_50 {dimension_numbers = #tpu.dot_dimension_numbers<[1], [1], [0], [0], [0, 0, 1, 0], [], []>} : vector<8x256xf32>, vector<8x256xf32>, vector<8x8xf32> -> vector<8x8xf32>
    %cst_51 = arith.constant dense<0.000000e+00> : vector<8x8xf32>
    %131 = tpu.matmul %129, %79, %cst_51 {dimension_numbers = #tpu.dot_dimension_numbers<[1], [1], [0], [0], [0, 0, 1, 0], [], []>} : vector<8x256xf32>, vector<8x256xf32>, vector<8x8xf32> -> vector<8x8xf32>
    %cst_52 = arith.constant dense<0.000000e+00> : vector<8x256xf32>
    %132 = tpu.matmul %130, %79, %cst_52 {dimension_numbers = #tpu.dot_dimension_numbers<[1], [0], [0], [1], [0, 0, 1, 1], [], []>} : vector<8x8xf32>, vector<8x256xf32>, vector<8x256xf32> -> vector<8x256xf32>
    %cst_53 = arith.constant dense<0.000000e+00> : vector<8x256xf32>
    %133 = tpu.matmul %131, %76, %cst_53 {dimension_numbers = #tpu.dot_dimension_numbers<[1], [0], [0], [1], [0, 0, 1, 1], [], []>} : vector<8x8xf32>, vector<8x256xf32>, vector<8x256xf32> -> vector<8x256xf32>
    %134 = arith.addf %132, %133 : vector<8x256xf32>
    %cst_54 = arith.constant 5.000000e-01 : f32
    %135 = vector.broadcast %cst_54 : f32 to vector<8x256xf32>
    %136 = arith.mulf %135, %134 : vector<8x256xf32>
    %137 = vector.broadcast %105 : vector<1x256xf32> to vector<8x256xf32>
    %138 = arith.mulf %136, %137 : vector<8x256xf32>
    %139 = vector.broadcast %73 : vector<1x256xf32> to vector<8x256xf32>
    %140 = arith.mulf %19, %139 : vector<8x256xf32>
    %cst_55 = arith.constant dense<0.000000e+00> : vector<8x8xf32>
    %141 = tpu.matmul %140, %44, %cst_55 {dimension_numbers = #tpu.dot_dimension_numbers<[1], [1], [0], [0], [0, 0, 1, 0], [], []>} : vector<8x256xf32>, vector<8x256xf32>, vector<8x8xf32> -> vector<8x8xf32>
    %cst_56 = arith.constant dense<0.000000e+00> : vector<8x8xf32>
    %142 = tpu.matmul %140, %47, %cst_56 {dimension_numbers = #tpu.dot_dimension_numbers<[1], [1], [0], [0], [0, 0, 1, 0], [], []>} : vector<8x256xf32>, vector<8x256xf32>, vector<8x8xf32> -> vector<8x8xf32>
    %cst_57 = arith.constant dense<0.000000e+00> : vector<8x256xf32>
    %143 = tpu.matmul %141, %47, %cst_57 {dimension_numbers = #tpu.dot_dimension_numbers<[1], [0], [0], [1], [0, 0, 1, 1], [], []>} : vector<8x8xf32>, vector<8x256xf32>, vector<8x256xf32> -> vector<8x256xf32>
    %cst_58 = arith.constant dense<0.000000e+00> : vector<8x256xf32>
    %144 = tpu.matmul %142, %44, %cst_58 {dimension_numbers = #tpu.dot_dimension_numbers<[1], [0], [0], [1], [0, 0, 1, 1], [], []>} : vector<8x8xf32>, vector<8x256xf32>, vector<8x256xf32> -> vector<8x256xf32>
    %145 = arith.addf %143, %144 : vector<8x256xf32>
    %cst_59 = arith.constant 5.000000e-01 : f32
    %146 = vector.broadcast %cst_59 : f32 to vector<8x256xf32>
    %147 = arith.mulf %146, %145 : vector<8x256xf32>
    %148 = vector.broadcast %73 : vector<1x256xf32> to vector<8x256xf32>
    %149 = arith.mulf %147, %148 : vector<8x256xf32>
    %150 = vector.broadcast %105 : vector<1x256xf32> to vector<8x256xf32>
    %151 = arith.mulf %19, %150 : vector<8x256xf32>
    %cst_60 = arith.constant dense<0.000000e+00> : vector<8x8xf32>
    %152 = tpu.matmul %151, %76, %cst_60 {dimension_numbers = #tpu.dot_dimension_numbers<[1], [1], [0], [0], [0, 0, 1, 0], [], []>} : vector<8x256xf32>, vector<8x256xf32>, vector<8x8xf32> -> vector<8x8xf32>
    %cst_61 = arith.constant dense<0.000000e+00> : vector<8x8xf32>
    %153 = tpu.matmul %151, %79, %cst_61 {dimension_numbers = #tpu.dot_dimension_numbers<[1], [1], [0], [0], [0, 0, 1, 0], [], []>} : vector<8x256xf32>, vector<8x256xf32>, vector<8x8xf32> -> vector<8x8xf32>
    %cst_62 = arith.constant dense<0.000000e+00> : vector<8x256xf32>
    %154 = tpu.matmul %152, %79, %cst_62 {dimension_numbers = #tpu.dot_dimension_numbers<[1], [0], [0], [1], [0, 0, 1, 1], [], []>} : vector<8x8xf32>, vector<8x256xf32>, vector<8x256xf32> -> vector<8x256xf32>
    %cst_63 = arith.constant dense<0.000000e+00> : vector<8x256xf32>
    %155 = tpu.matmul %153, %76, %cst_63 {dimension_numbers = #tpu.dot_dimension_numbers<[1], [0], [0], [1], [0, 0, 1, 1], [], []>} : vector<8x8xf32>, vector<8x256xf32>, vector<8x256xf32> -> vector<8x256xf32>
    %156 = arith.addf %154, %155 : vector<8x256xf32>
    %cst_64 = arith.constant 5.000000e-01 : f32
    %157 = vector.broadcast %cst_64 : f32 to vector<8x256xf32>
    %158 = arith.mulf %157, %156 : vector<8x256xf32>
    %159 = vector.broadcast %105 : vector<1x256xf32> to vector<8x256xf32>
    %160 = arith.mulf %158, %159 : vector<8x256xf32>
    %161 = tpu.concatenate %116, %127, %138, %149, %160 in 0 : vector<8x256xf32>, vector<8x256xf32>, vector<8x256xf32>, vector<8x256xf32>, vector<8x256xf32> -> vector<40x256xf32>
    %cst_65 = arith.constant dense<0.000000e+00> : vector<4x256xf32>
    %162 = tpu.matmul %1, %161, %cst_65 {dimension_numbers = #tpu.dot_dimension_numbers<[1], [0], [0], [1], [0, 0, 1, 1], [], []>} : vector<4x40xf32>, vector<40x256xf32>, vector<4x256xf32> -> vector<4x256xf32>
    %163 = vector.broadcast %5 : vector<4x1xf32> to vector<4x256xf32>
    %164 = arith.addf %162, %163 : vector<4x256xf32>
    %cst_66 = arith.constant dense<0.000000e+00> : vector<4x256xf32>
    %165 = tpu.matmul %2, %164, %cst_66 {dimension_numbers = #tpu.dot_dimension_numbers<[1], [0], [0], [1], [0, 0, 1, 1], [], []>} : vector<4x4xf32>, vector<4x256xf32>, vector<4x256xf32> -> vector<4x256xf32>
    %166 = vector.broadcast %6 : vector<4x1xf32> to vector<4x256xf32>
    %167 = arith.addf %165, %166 : vector<4x256xf32>
    %168 = vector.extract_strided_slice %8 {offsets = [0, 0], sizes = [4, 256], strides = [1, 1]} : vector<4x768xf32> to vector<4x256xf32>
    %169 = arith.addf %167, %168 : vector<4x256xf32>
    %c0_67 = arith.constant 0 : index
    %c0_68 = arith.constant 0 : index
    %c0_69 = arith.constant 0 : index
    %170 = vector.load %arg6[%c0_67, %c0_68, %c0_69] : memref<1x4x256xf32, #tpu.memory_space<vmem>>, vector<1x4x256xf32>
    %171 = vector.shape_cast %170 : vector<1x4x256xf32> to vector<4x256xf32>
    %172 = vector.shape_cast %169 : vector<4x256xf32> to vector<1x4x256xf32>
    tpu.vector_store %arg6[%c0_67, %c0_68, %c0_69], %172 {strides = array<i32>} : memref<1x4x256xf32, #tpu.memory_space<vmem>>, vector<1x4x256xf32>,
    return
  }
  func.func @transform_0(%arg0: i32) -> (i32, i32, i32) {
    %c0_i32 = arith.constant 0 : i32
    %c0_i32_0 = arith.constant 0 : i32
    %c0_i32_1 = arith.constant 0 : i32
    return %arg0, %c0_i32, %c0_i32_0 : i32, i32, i32
  }
  func.func @transform_1(%arg0: i32) -> (i32, i32) {
    %c0_i32 = arith.constant 0 : i32
    %c0_i32_0 = arith.constant 0 : i32
    %c0_i32_1 = arith.constant 0 : i32
    return %c0_i32, %c0_i32_0 : i32, i32
  }
  func.func @transform_2(%arg0: i32) -> (i32, i32) {
    %c0_i32 = arith.constant 0 : i32
    %c0_i32_0 = arith.constant 0 : i32
    %c0_i32_1 = arith.constant 0 : i32
    return %c0_i32, %c0_i32_0 : i32, i32
  }
  func.func @transform_3(%arg0: i32) -> (i32, i32) {
    %c0_i32 = arith.constant 0 : i32
    %c0_i32_0 = arith.constant 0 : i32
    %c0_i32_1 = arith.constant 0 : i32
    return %c0_i32, %c0_i32_0 : i32, i32
  }
  func.func @transform_4(%arg0: i32) -> (i32, i32) {
    %c0_i32 = arith.constant 0 : i32
    %c0_i32_0 = arith.constant 0 : i32
    %c0_i32_1 = arith.constant 0 : i32
    return %c0_i32, %c0_i32_0 : i32, i32
  }
  func.func @transform_5(%arg0: i32) -> (i32, i32, i32) {
    %c0_i32 = arith.constant 0 : i32
    %c0_i32_0 = arith.constant 0 : i32
    %c0_i32_1 = arith.constant 0 : i32
    return %arg0, %c0_i32, %c0_i32_0 : i32, i32, i32
  }
}

</mosaic_0001>

<bundles_post_ra>
// kernel: tpu_custom_call.1
= control target key start
LH: loop header
LB: loop body
LE: loop exit
PB: predicated region body
PF: predicated region fallthrough
CT: control target
= control target key end

     0   :  { %10 = vsyncpa [#allocation3], 0  ;;  %s3001_s0 = inlined_call_operand.vmem [shape: f32[2,4,768], index: 0, kind: input, shape index: {}]   ;;  %s3002_s1 = inlined_call_operand.vmem [shape: f32[40,4], index: 1, kind: input, shape index: {}]   ;;  %s3003_s2 = inlined_call_operand.vmem [shape: f32[4,40], index: 2, kind: input, shape index: {}]   ;;  %s3004_s3 = inlined_call_operand.vmem [shape: f32[4,4], index: 3, kind: input, shape index: {}]   ;;  %s3005_s4 = inlined_call_operand.vmem [shape: f32[32,1], index: 4, kind: input, shape index: {}]   ;;  %s3006_s5 = inlined_call_operand.hbm [shape: f32[2,4,256], index: 5, kind: output, shape index: {}]  }
   0x1   :  { %12 = vsyncpa [#allocation3 + $0x1], 0  ;;  %s2632_s18 = smov 0   ;;  %s2634_s19 = smov 0  }
   0x2   :  { %s2636_s20 = smov 0   ;;  %s2638_s21 = smov 0  }
   0x3 LB: > { %s2653_s22 = sadd.s32 4294967295, %s2597_s21   ;;  %s2431_s23 = sadd.s32 4294967294, %s2597_s21   ;;  %s2597_s21 = sphi %s2638_s21, %s3012_s21   ;;  %s2593_s20 = sphi %s2636_s20, %s3011_s20   ;;  %s2589_s19 = sphi %s2634_s19, %s3010_s19   ;;  %s2585_s18 = sphi %s2632_s18, %s3009_s18  }
   0x4   : > { %s2657_s24 = sadd.s32 1, %s2597_s21   ;;  %s135_s25 = sadd.s32 1, %s2593_s20 }
   0x5   : > { %s132_s26 = ssub.s32 %s2597_s21, %s2657_s24  ;;  %p145_p0 = scmp.ne.s32.totalorder %s2593_s20, %s2589_s19 }
   0x6   : > { %p133_p1 = scmp.eq.s32.totalorder %s132_s26, 0  ;;  %p146_p2 = scmp.eq.s32.totalorder %s2653_s22, 1 }
   0x7   : > { %p151_p3 = scmp.ne.s32.totalorder %s2589_s19, %s2585_s18  ;;  %p152_p4 = scmp.eq.s32.totalorder %s2431_s23, 1 }
   0x8   : > { %s2668_s27 = scalar_select %p133_p1, %s2593_s20, %s135_s25  }
   0x9   : > { %p2670_p5 = por %p146_p2, %p145_p0  ;;  %p2674_p6 = por %p152_p4, %p151_p3 }
   0xa   : > { %p2434_p7 = scmp.ge.s32.totalorder %s2597_s21, 1  ;;  %p190_p8 = scmp.lt.s32.totalorder %s2597_s21, 3 }
   0xc   : > { %p191_p9 = pnand %p2434_p7, %p190_p8 }
   0xd   : > { %p218_p10 = scmp.lt.s32.totalorder (!%p191_p9), %s2653_s22, 1  ;;  %s215_s16 = sand.u32 (!%p191_p9), 1, %s2589_s19  }
   0xe   : > { %194 = sbr.rel (%p191_p9) target bundleno = 2026 (0x7ea), region = 40  ;;  %s2435_s17 = sshll.u32 (!%p191_p9), %s215_s16, 3 }
   0xf   : > { %s2477_s23 = sshll.u32 (!%p191_p9), %s2653_s22, 7  ;;  %s217_s25 = scalar_lea.vmem (!%p191_p9), [#allocation2], %s2435_s17 }
  0x10   : > { %s2372_s26 = sshll.u32 (!%p191_p9), %s217_s25, 4  ;;  %s2370_s7 = scalar_lea.hbm (!%p191_p9), %s3006_s5, %s2477_s23  ;;  %s2373_s26 = int_to_ptr.vmem [resolvable:$true] %s2372_s26 }
  0x11   : > { %s2537_s9 = scalar_lea.vmem (!%p191_p9), %s2373_s26, 128 }
  0x12   : > { %p2538_p11 = scmp.ne.s32.totalorder (!%p191_p9), %s2373_s26, %s2537_s9 }
  0x13   : > { %v2599_v0 = vmov 0.0   ;;  %s219_s30 = scalar_select %p218_p10, %s2653_s22, 1  ;;  %v2600_v1 = vmov 0   ;;  %v230_v2 = vld [vmem:[%s3005_s4] sm:$0xff]  ;;  %vm259_vm0 = vcmask 1043456   ;;  %vm243_vm1 = vcmask 31744  }
  0x14   : > { %336 = vmatprep.mubr.f32.mxu0 %v2599_v0  ;;  %427 = vmatprep.mubr.f32.mxu1 %v2599_v0  ;;  %v223_v8 = vld [vmem:[%s3002_s1] sm:$0xff]  ;;  %v224_v10 = vld [vmem:[%s3002_s1 + $0x8] sm:$0xff]  ;;  %v225_v11 = vld [vmem:[%s3002_s1 + $0x10] sm:$0xff]  ;;  %vm858_vm8 = vcmask 64512   ;;  %vm2192_vm9 = vcmask 326656   ;;  %p2539_p12 = pnand %p2538_p11, %p2670_p5  ;;  %s2601_s22 = smov [#allocation2]  }
  0x15   : > { %2520 = vset.pattern.permute.xlu1 %v2600_v1  ;;  %2521 = vset.pattern.permute.xlu0 %v2600_v1  ;;  %s2478_s8 = smul.u32 24, %s219_s30  ;;  %v226_v12 = vld [vmem:[%s3002_s1 + $0x18] sm:$0xff]  ;;  %v227_v13 = vld [vmem:[%s3002_s1 + $0x20] sm:$0xff]  ;;  %v231_v56 = vld [vmem:[%s3005_s4 + $0x8] sm:$0xff]  ;;  %s2541_s10 = sshll.u32 %s2601_s22, 4  ;;  %s2542_s10 = int_to_ptr.vmem [resolvable:$false] %s2541_s10 }
  0x16   : > { %551 = vperm.xlu1 %2520, %v230_v2   ;;  %v232_v57 = vld [vmem:[%s3005_s4 + $0x10] sm:$0xff]  ;;  %v233_v62 = vld [vmem:[%s3005_s4 + $0x18] sm:$0xff]  ;;  %p2540_p13 = pneg %p2539_p12  ;;  %p2544_p0 = scmp.lt.s32.totalorder %s2373_s26, %s2542_s10 }
  0x17   : > { %s222_s11 = scalar_lea.vmem %s3001_s0, %s2478_s8  ;;  %s2358_s8 = scalar_lea.sflag [#allocation3], %s215_s16 }
  0x18   : > { %v2690_v3 = vld [vmem:[%s222_s11] sm:$0xff]  ;;  %v236_v4 = vld [vmem:[%s222_s11 + $0x10] sm:$0xff]  ;;  %v235_v5 = vld [vmem:[%s222_s11 + $0x8] sm:$0xff]  ;;  %s2543_s11 = scalar_lea.vmem %s2542_s10, 256 }
  0x19   : > { %v2694_v6 = vcombine.high %v2690_v3, %v2690_v3  ;;  %v241_v7 = vcombine.high %v235_v5, %v235_v5  ;;  %v242_v9 = vcombine.high %v236_v4, %v236_v4  ;;  %p2545_p1 = scmp.lt.s32.totalorder %s2543_s11, %s2537_s9 }
  0x1b   : > { %2437 = vmatprep.subr.msk.mxu0 %vm259_vm0, %v2694_v6  ;;  %2444 = vmatprep.subr.msk.mxu1 %vm259_vm0, %v241_v7  ;;  %p2546_p2 = por %p2545_p1, %p2544_p0 }
  0x1c   : > { %2438 = vmatpush1.msk.msra.mxu0 %vm259_vm0, %v2690_v3  ;;  %2445 = vmatpush1.msk.msra.mxu1 %vm259_vm0, %v235_v5 }
  0x1d   : > { %2439 = vmatmul.mubr.msk.f32.vlgmr.msra.gmra.mxu0 %vm243_vm1, %v223_v8  ;;  %2446 = vmatmul.mubr.msk.f32.vlgmr.msra.gmra.mxu1 %vm243_vm1, %v223_v8  ;;  %p2547_p3 = pnand %p2546_p2, %p2540_p13 }
  0x1e   : > { %342 = vmatprep.mubr.f32.mxu0 %v2599_v0  ;;  %433 = vmatprep.mubr.f32.mxu1 %v2599_v0 }
  0x1f   : > { %2451 = vmatprep.subr.msk.mxu0 %vm259_vm0, %v242_v9 }
  0x20   : > { %2452 = vmatpush1.msk.msra.mxu0 %vm259_vm0, %v236_v4 }
  0x21   : > { %2440 = vmatmul.mubr.msk.f32.gmra.mxu0 %vm243_vm1, %v224_v10  ;;  %2447 = vmatmul.mubr.msk.f32.gmra.mxu1 %vm243_vm1, %v224_v10 }
  0x22   : > { %348 = vmatprep.mubr.f32.mxu0 %v2599_v0  ;;  %439 = vmatprep.mubr.f32.mxu1 %v2599_v0 }
  0x25   : > { %2441 = vmatmul.mubr.msk.f32.gmra.mxu0 %vm243_vm1, %v225_v11  ;;  %2448 = vmatmul.mubr.msk.f32.gmra.mxu1 %vm243_vm1, %v225_v11 }
  0x26   : > { %354 = vmatprep.mubr.f32.mxu0 %v2599_v0  ;;  %443 = vmatprep.mubr.f32.mxu1 %v2599_v0 }
  0x29   : > { %2442 = vmatmul.mubr.msk.f32.gmra.mxu0 %vm243_vm1, %v226_v12  ;;  %2449 = vmatmul.mubr.msk.f32.gmra.mxu1 %vm243_vm1, %v226_v12 }
  0x2a   : > { %358 = vmatprep.mubr.f32.mxu0 %v2599_v0  ;;  %449 = vmatprep.mubr.f32.mxu1 %v2599_v0 }
  0x2d   : > { %2443 = vmatmul.mubr.msk.f32.gmra.mxu0 %vm243_vm1, %v227_v13  ;;  %2450 = vmatmul.mubr.msk.f32.gmra.mxu1 %vm243_vm1, %v227_v13 }
  0x2e   : > { %518 = vmatprep.mubr.f32.mxu0 %v2599_v0 }
  0x31   : > { %2453 = vmatmul.mubr.msk.f32.vlgmr.msra.gmra.mxu0 %vm243_vm1, %v223_v8 }
  0x32   : > { %524 = vmatprep.mubr.f32.mxu0 %v2599_v0 }
  0x35   : > { %2454 = vmatmul.mubr.msk.f32.gmra.mxu0 %vm243_vm1, %v224_v10 }
  0x36   : > { %530 = vmatprep.mubr.f32.mxu0 %v2599_v0 }
  0x39   : > { %2455 = vmatmul.mubr.msk.f32.gmra.mxu0 %vm243_vm1, %v225_v11 }
  0x3a   : > { %534 = vmatprep.mubr.f32.mxu0 %v2599_v0 }
  0x3d   : > { %2456 = vmatmul.mubr.msk.f32.gmra.mxu0 %vm243_vm1, %v226_v12 }
  0x3e   : > { %538 = vmatprep.mubr.f32.mxu0 %v2599_v0 }
  0x41   : > { %2457 = vmatmul.mubr.msk.f32.gmra.mxu0 %vm243_vm1, %v227_v13 }
  0x91   : > { %v2806_v63 = vpop.permute.xlu1 %551 }
  0xdd   : > { %v338_v14 = vpop.f32.mrf.mxu0  ;;  %v429_v15 = vpop.f32.mrf.mxu1 }
  0xde   : > { %v2749_v19 = vmax.f32 %v338_v14, 0.0  ;;  %v2772_v34 = vmax.f32 %v429_v15, 0.0 }
  0xdf   : > { %v340_v16 = vpop.f32.mrf.mxu0  ;;  %v431_v17 = vpop.f32.mrf.mxu1 }
  0xe0   : > { %v2747_v18 = vmax.f32 %v340_v16, 0.0  ;;  %v2774_v35 = vmax.f32 %v431_v17, 0.0 }
  0xe1   : > { %v344_v20 = vpop.f32.mrf.mxu0  ;;  %v435_v21 = vpop.f32.mrf.mxu1 }
  0xe2   : > { %748 = vmatprep.subr.mxu1 %v2747_v18  ;;  %v2752_v22 = vmax.f32 %v435_v21, 0.0  ;;  %v2755_v25 = vmax.f32 %v344_v20, 0.0  ;;  %v559_v37 = vadd.f32 %v2747_v18, %v2749_v19  ;;  %v616_v39 = vadd.f32 %v2774_v35, %v2772_v34 }
  0xe3   : > { %v346_v23 = vpop.f32.mrf.mxu0  ;;  %749 = vmatpush1.xpose.msra.mxu1 %v2749_v19  ;;  %v437_v24 = vpop.f32.mrf.mxu1 }
  0xe4   : > { %v2757_v26 = vmax.f32 %v346_v23, 0.0  ;;  %v2759_v27 = vmax.f32 %v437_v24, 0.0 }
  0xe5   : > { %v2761_v28 = vpop.f32.mrf.mxu0  ;;  %v441_v29 = vpop.f32.mrf.mxu1 }
  0xe6   : > { %818 = vmatprep.subr.mxu1 %v2757_v26  ;;  %v556_v30 = vadd.f32 %v2757_v26, %v2755_v25  ;;  %v613_v31 = vadd.f32 %v2759_v27, %v2752_v22  ;;  %1113 = vmatprep.subr.mxu0 %v2759_v27 }
  0xe7   : > { %v2769_v32 = vpop.f32.mrf.mxu0  ;;  %v442_v33 = vpop.f32.mrf.mxu1  ;;  %1114 = vmatpush1.xpose.msra.mxu0 %v2752_v22 }
  0xe8   : > { %557 = vadd.xlane.f32.xlu0 %v556_v30  ;;  %614 = vadd.xlane.f32.xlu1 %v613_v31 }
  0xe9   : > { %v356_v36 = vpop.f32.mrf.mxu0  ;;  %1260 = vmatprep.subr.mxu0 %v2759_v27  ;;  %v2799_v58 = vpop.f32.mrf.mxu1 }
  0xeb   : > { %v357_v38 = vpop.f32.mrf.mxu0  ;;  %v2801_v59 = vpop.f32.mrf.mxu1 }
  0xec   : > { %560 = vadd.xlane.f32.xlu0 %v559_v37 }
  0xed   : > { %v360_v40 = vpop.f32.mrf.mxu0  ;;  %v451_v60 = vpop.f32.mrf.mxu1 }
  0xef   : > { %v361_v41 = vpop.f32.mrf.mxu0  ;;  %v452_v61 = vpop.f32.mrf.mxu1 }
  0xf0   : > { %617 = vadd.xlane.f32.xlu0 %v616_v39 }
  0xf1   : > { %v520_v42 = vpop.f32.mrf.mxu0 }
  0xf2   : > { %v2783_v47 = vmax.f32 %v520_v42, 0.0 }
  0xf3   : > { %v522_v43 = vpop.f32.mrf.mxu0 }
  0xf4   : > { %v2785_v48 = vmax.f32 %v522_v43, 0.0 }
  0xf5   : > { %v526_v44 = vpop.f32.mrf.mxu0 }
  0xf6   : > { %v2781_v45 = vmax.f32 %v526_v44, 0.0  ;;  %v673_v53 = vadd.f32 %v2785_v48, %v2783_v47 }
  0xf7   : > { %v528_v46 = vpop.f32.mrf.mxu0 }
  0xf8   : > { %v2787_v49 = vmax.f32 %v528_v46, 0.0 }
  0xf9   : > { %v532_v50 = vpop.f32.mrf.mxu0 }
  0xfa   : > { %v670_v51 = vadd.f32 %v2787_v49, %v2781_v45 }
  0xfb   : > { %v533_v52 = vpop.f32.mrf.mxu0 }
  0xfc   : > { %671 = vadd.xlane.f32.xlu1 %v670_v51 }
  0xfd   : > { %v536_v54 = vpop.f32.mrf.mxu0 }
  0xff   : > { %v537_v55 = vpop.f32.mrf.mxu0 }
 0x100   : > { %674 = vadd.xlane.f32.xlu1 %v673_v53 }
 0x106   : > { %608 = vperm.xlu0 %2521, %v231_v56  }
 0x10a   : > { %2189 = vperm.xlu0 %2521, %v233_v62  }
 0x111   : > { %665 = vperm.xlu1 %2520, %v232_v57  }
 0x171   : > { %v558_v1 = vpop.xlane.xlu0 %557  ;;  %v615_v2 = vpop.xlane.xlu1 %614 }
 0x172   : > { %v562_v4 = vmul.f32 %v558_v1, %v2749_v19  ;;  %v563_v5 = vmul.f32 %v558_v1, %v2747_v18  ;;  %v619_v7 = vmul.f32 %v615_v2, %v2772_v34  ;;  %v620_v8 = vmul.f32 %v615_v2, %v2774_v35 }
 0x174   : > { %v564_v9 = vrot.slane %v562_v4, 4  ;;  %v570_v10 = vrot.slane %v563_v5, 4  ;;  %v621_v11 = vrot.slane %v619_v7, 4  ;;  %v627_v12 = vrot.slane %v620_v8, 4 }
 0x175   : > { %v561_v13 = vpop.xlane.xlu0 %560 }
 0x176   : > { %v565_v14 = vadd.f32 %v564_v9, %v562_v4  ;;  %v571_v15 = vadd.f32 %v570_v10, %v563_v5  ;;  %v576_v16 = vmul.f32 %v561_v13, %v2755_v25  ;;  %v577_v17 = vmul.f32 %v561_v13, %v2757_v26 }
 0x177   : > { %v622_v20 = vadd.f32 %v621_v11, %v619_v7  ;;  %v628_v21 = vadd.f32 %v627_v12, %v620_v8 }
 0x178   : > { %v566_v23 = vrot.slane %v565_v14, 2  ;;  %v572_v24 = vrot.slane %v571_v15, 2  ;;  %v578_v29 = vrot.slane %v576_v16, 4  ;;  %v584_v30 = vrot.slane %v577_v17, 4 }
 0x179   : > { %v623_v31 = vrot.slane %v622_v20, 2  ;;  %v629_v33 = vrot.slane %v628_v21, 2  ;;  %v618_v36 = vpop.xlane.xlu0 %617 }
 0x17a   : > { %v567_v37 = vadd.f32 %v566_v23, %v565_v14  ;;  %v573_v38 = vadd.f32 %v572_v24, %v571_v15  ;;  %v579_v39 = vadd.f32 %v578_v29, %v576_v16  ;;  %v585_v40 = vadd.f32 %v584_v30, %v577_v17 }
 0x17b   : > { %v633_v41 = vmul.f32 %v618_v36, %v2752_v22  ;;  %v634_v42 = vmul.f32 %v618_v36, %v2759_v27  ;;  %v624_v46 = vadd.f32 %v623_v31, %v622_v20  ;;  %v630_v50 = vadd.f32 %v629_v33, %v628_v21 }
 0x17c   : > { %v580_v43 = vrot.slane %v579_v39, 2  ;;  %v586_v44 = vrot.slane %v585_v40, 2  ;;  %v568_v53 = vrot.slane %v567_v37, 1  ;;  %v574_v54 = vrot.slane %v573_v38, 1 }
 0x17d   : > { %v635_v51 = vrot.slane %v633_v41, 4  ;;  %v641_v52 = vrot.slane %v634_v42, 4  ;;  %v625_v1 = vrot.slane %v624_v46, 1  ;;  %v631_v2 = vrot.slane %v630_v50, 1 }
 0x17e   : > { %v581_v55 = vadd.f32 %v580_v43, %v579_v39  ;;  %v587_v56 = vadd.f32 %v586_v44, %v585_v40  ;;  %v569_v7 = vadd.f32 %v568_v53, %v567_v37  ;;  %v575_v8 = vadd.f32 %v574_v54, %v573_v38 }
 0x17f   : > { %v636_v57 = vadd.f32 %v635_v51, %v633_v41  ;;  %v642_v60 = vadd.f32 %v641_v52, %v634_v42  ;;  %v626_v15 = vadd.f32 %v625_v1, %v624_v46  ;;  %v632_v16 = vadd.f32 %v631_v2, %v630_v50 }
 0x180   : > { %v582_v61 = vrot.slane %v581_v55, 1  ;;  %v588_v62 = vrot.slane %v587_v56, 1  ;;  %v2822_v42 = vadd.f32 %v2806_v63, %v2761_v28  ;;  %v2826_v44 = vadd.f32 %v2806_v63, %v2769_v32 }
 0x181   : > { %v637_v4 = vrot.slane %v636_v57, 2  ;;  %v643_v5 = vrot.slane %v642_v60, 2  ;;  %v609_v50 = vpop.permute.xlu0 %608 }
 0x182   : > { %v583_v9 = vadd.f32 %v582_v61, %v581_v55  ;;  %v589_v10 = vadd.f32 %v588_v62, %v587_v56  ;;  %v611_v28 = vadd.f32 %v609_v50, %v2799_v58  ;;  %v612_v54 = vadd.f32 %v609_v50, %v2801_v59 }
 0x183   : > { %v638_v11 = vadd.f32 %v637_v4, %v636_v57  ;;  %v644_v12 = vadd.f32 %v643_v5, %v642_v60 }
 0x184   : > { %v590_v13 = vadd.f32 %v583_v9, %v569_v7  ;;  %v591_v14 = vadd.f32 %v589_v10, %v575_v8 }
 0x185   : > { %v639_v17 = vrot.slane %v638_v11, 1  ;;  %v645_v20 = vrot.slane %v644_v12, 1 }
 0x186   : > { %v592_v21 = vmul.f32 0.5, %v590_v13  ;;  %v593_v23 = vmul.f32 0.5, %v591_v14 }
 0x187   : > { %v640_v24 = vadd.f32 %v639_v17, %v638_v11  ;;  %v646_v29 = vadd.f32 %v645_v20, %v644_v12 }
 0x188   : > { %vm594_vm2 = vcmp.ne.f32.partialorder %v592_v21, 0.0  ;;  %vm595_vm3 = vcmp.ne.f32.partialorder %v593_v23, 0.0 }
 0x189   : > { %v596_v30 = vsel %vm594_vm2, %v592_v21, 1.0  ;;  %v647_v31 = vadd.f32 %v640_v24, %v626_v15  ;;  %v648_v33 = vadd.f32 %v646_v29, %v632_v16  ;;  %v597_v36 = vsel %vm595_vm3, %v593_v23, 1.0 }
 0x18a   : > { %2525 = vrsqrt.f32 %v596_v30 }
 0x18b   : > { %v649_v37 = vmul.f32 0.5, %v647_v31  ;;  %v650_v38 = vmul.f32 0.5, %v648_v33  ;;  %2527 = vrsqrt.f32 %v597_v36 }
 0x18d   : > { %vm651_vm4 = vcmp.ne.f32.partialorder %v649_v37, 0.0  ;;  %vm652_vm5 = vcmp.ne.f32.partialorder %v650_v38, 0.0 }
 0x18e   : > { %v653_v39 = vsel %vm651_vm4, %v649_v37, 1.0  ;;  %v654_v40 = vsel %vm652_vm5, %v650_v38, 1.0 }
 0x18f   : > { %2529 = vrsqrt.f32 %v653_v39 }
 0x190   : > { %2531 = vrsqrt.f32 %v654_v40 }
 0x197   : > { %v2526_v41 = vpop.eup %2525 }
 0x198   : > { %v2528_v43 = vpop.eup %2527  ;;  %v2829_v46 = vsel %vm594_vm2, %v2526_v41, 0.0 }
 0x199   : > { %v2832_v51 = vsel %vm595_vm3, %v2528_v43, 0.0  ;;  %v716_v52 = vmul.f32 %v2829_v46, %v2822_v42  ;;  %v540_v43 = vpop.f32.mrf.mxu0 }
 0x19a   : > { %v717_v53 = vmul.f32 %v2832_v51, %v2826_v44 }
 0x19c   : > { %782 = vmatprep.mubr.f32.mxu1 %v717_v53  ;;  %v2530_v32 = vpop.eup %2529 }
 0x19d   : > { %783 = vmatmul.mubr.f32.vlgmr.msra.gmra.mxu1 %v716_v52  ;;  %v2532_v63 = vpop.eup %2531  ;;  %v2842_v55 = vsel %vm651_vm4, %v2530_v32, 0.0 }
 0x19e   : > { %819 = vmatpush1.xpose.msra.mxu1 %v2755_v25  ;;  %852 = vmatprep.mubr.f32.mxu1 %v717_v53  ;;  %v2846_v56 = vsel %vm652_vm5, %v2532_v63, 0.0  ;;  %v2849_v57 = vmul.f32 %v2842_v55, %v611_v28  ;;  %v542_v53 = vpop.f32.mrf.mxu0 }
 0x19f   : > { %892 = vmatprep.subr.mxu1 %v2747_v18  ;;  %v2852_v58 = vmul.f32 %v2846_v56, %v612_v54  ;;  %v672_v18 = vpop.xlane.xlu1 %671 }
 0x1a0   : > { %v677_v60 = vmul.f32 %v672_v18, %v2785_v48  ;;  %v676_v61 = vmul.f32 %v672_v18, %v2783_v47 }
 0x1a1   : > { %853 = vmatmul.mubr.f32.vlgmr.msra.gmra.mxu1 %v716_v52  ;;  %1147 = vmatprep.mubr.f32.mxu0 %v2852_v58 }
 0x1a2   : > { %893 = vmatpush1.msra.mxu1 %v2749_v19  ;;  %1148 = vmatmul.mubr.f32.vlgmr.msra.gmra.mxu0 %v2849_v57  ;;  %v684_v62 = vrot.slane %v677_v60, 4  ;;  %v678_v2 = vrot.slane %v676_v61, 4 }
 0x1a3   : > { %966 = vmatprep.subr.mxu1 %v2757_v26  ;;  %1261 = vmatpush1.msra.mxu0 %v2752_v22  ;;  %v675_v59 = vpop.xlane.xlu1 %674 }
 0x1a4   : > { %926 = vmatprep.mubr.f32.mxu1 %v2599_v0  ;;  %1407 = vmatprep.subr.mxu0 %v2787_v49  ;;  %v691_v19 = vmul.f32 %v675_v59, %v2787_v49  ;;  %v690_v26 = vmul.f32 %v675_v59, %v2781_v45  ;;  %v685_v5 = vadd.f32 %v684_v62, %v677_v60 }
 0x1a5   : > { %1294 = vmatprep.mubr.f32.mxu0 %v2599_v0  ;;  %v679_v8 = vadd.f32 %v678_v2, %v676_v61 }
 0x1a6   : > { %v698_v1 = vrot.slane %v691_v19, 4  ;;  %v692_v4 = vrot.slane %v690_v26, 4  ;;  %v686_v10 = vrot.slane %v685_v5, 2 }
 0x1a7   : > { %v680_v12 = vrot.slane %v679_v8, 2  ;;  %v666_v59 = vpop.permute.xlu1 %665 }
 0x1a8   : > { %v699_v7 = vadd.f32 %v698_v1, %v691_v19  ;;  %v693_v9 = vadd.f32 %v692_v4, %v690_v26  ;;  %v687_v14 = vadd.f32 %v686_v10, %v685_v5  ;;  %v669_v19 = vadd.f32 %v666_v59, %v542_v53 }
 0x1a9   : > { %v681_v16 = vadd.f32 %v680_v12, %v679_v8  ;;  %v668_v26 = vadd.f32 %v666_v59, %v540_v43 }
 0x1aa   : > { %v700_v11 = vrot.slane %v699_v7, 2  ;;  %v694_v13 = vrot.slane %v693_v9, 2  ;;  %v688_v20 = vrot.slane %v687_v14, 1 }
 0x1ab   : > { %v682_v23 = vrot.slane %v681_v16, 1 }
 0x1ac   : > { %v701_v15 = vadd.f32 %v700_v11, %v699_v7  ;;  %v695_v17 = vadd.f32 %v694_v13, %v693_v9  ;;  %v689_v29 = vadd.f32 %v688_v20, %v687_v14  ;;  %v1600_v13 = vmul.f32 %v2846_v56, %v2826_v44 }
 0x1ad   : > { %v683_v31 = vadd.f32 %v682_v23, %v681_v16 }
 0x1ae   : > { %v702_v21 = vrot.slane %v701_v15, 1  ;;  %v696_v24 = vrot.slane %v695_v17, 1 }
 0x1b0   : > { %v703_v30 = vadd.f32 %v702_v21, %v701_v15  ;;  %v697_v33 = vadd.f32 %v696_v24, %v695_v17  ;;  %v1599_v15 = vmul.f32 %v2842_v55, %v2822_v42 }
 0x1b2   : > { %v705_v36 = vadd.f32 %v703_v30, %v689_v29  ;;  %v704_v37 = vadd.f32 %v697_v33, %v683_v31 }
 0x1b4   : > { %v707_v38 = vmul.f32 0.5, %v705_v36  ;;  %v706_v39 = vmul.f32 0.5, %v704_v37 }
 0x1b6   : > { %vm709_vm6 = vcmp.ne.f32.partialorder %v707_v38, 0.0  ;;  %vm708_vm7 = vcmp.ne.f32.partialorder %v706_v39, 0.0 }
 0x1b7   : > { %v711_v40 = vsel %vm709_vm6, %v707_v38, 1.0  ;;  %v710_v41 = vsel %vm708_vm7, %v706_v39, 1.0 }
 0x1b8   : > { %2533 = vrsqrt.f32 %v711_v40 }
 0x1b9   : > { %2535 = vrsqrt.f32 %v710_v41 }
 0x1c5   : > { %v2534_v18 = vpop.eup %2533 }
 0x1c6   : > { %v2536_v60 = vpop.eup %2535 }
 0x1c7   : > { %v2884_v61 = vsel %vm708_vm7, %v2536_v60, 0.0 }
 0x25d   : > { %v784_v50 = vpop.f32.mrf.mxu1 }
 0x25f   : > { %v786_v52 = vpop.f32.mrf.mxu1 }
 0x261   : > { %v854_v28 = vpop.f32.mrf.mxu1 }
 0x262   : > { %2458 = vmatmul.mubr.msk.f32.vlgmr.msra.gmra.mxu1 %vm858_vm8, %v854_v28  ;;  %v1149_v32 = vpop.f32.mrf.mxu0 }
 0x263   : > { %967 = vmatpush1.msra.mxu1 %v2755_v25  ;;  %v856_v54 = vpop.f32.mrf.mxu1  ;;  %1000 = vmatprep.mubr.f32.mxu1 %v2599_v0  ;;  %v2877_v25 = vsel %vm709_vm6, %v2534_v18, 0.0 }
 0x264   : > { %1043 = vmatprep.subr.mxu1 %v2774_v35  ;;  %v1151_v63 = vpop.f32.mrf.mxu0  ;;  %v1894_v24 = vmul.f32 %v2877_v25, %v2826_v44 }
 0x266   : > { %2459 = vmatmul.mubr.msk.f32.vlgmr.msra.gmra.mxu1 %vm858_vm8, %v784_v50 }
 0x267   : > { %1044 = vmatpush1.xpose.msra.mxu1 %v2772_v34  ;;  %1077 = vmatprep.mubr.f32.mxu1 %v2852_v58  ;;  %v1306_v58 = vmul.f32 %v2877_v25, %v669_v19 }
 0x268   : > { %1186 = vmatprep.subr.mxu1 %v2774_v35 }
 0x26a   : > { %1078 = vmatmul.mubr.f32.vlgmr.msra.gmra.mxu1 %v2849_v57  ;;  %v1305_v57 = vmul.f32 %v2884_v61, %v668_v26 }
 0x26b   : > { %1187 = vmatpush1.msra.mxu1 %v2772_v34  ;;  %1220 = vmatprep.mubr.f32.mxu1 %v2599_v0 }
 0x26c   : > { %1337 = vmatprep.subr.mxu1 %v2785_v48 }
 0x26e   : > { %2460 = vmatmul.mubr.msk.f32.vlgmr.msra.gmra.mxu1 %vm858_vm8, %v1149_v32 }
 0x26f   : > { %1338 = vmatpush1.xpose.msra.mxu1 %v2783_v47  ;;  %1371 = vmatprep.mubr.f32.mxu1 %v1306_v58 }
 0x270   : > { %1480 = vmatprep.subr.mxu1 %v2785_v48 }
 0x272   : > { %1372 = vmatmul.mubr.f32.vlgmr.msra.gmra.mxu1 %v1305_v57 }
 0x273   : > { %1481 = vmatpush1.msra.mxu1 %v2783_v47  ;;  %1514 = vmatprep.mubr.f32.mxu1 %v2599_v0 }
 0x274   : > { %1631 = vmatprep.subr.mxu1 %v2774_v35 }
 0x322   : > { %v928_v62 = vpop.f32.mrf.mxu1 }
 0x324   : > { %v930_v1 = vpop.f32.mrf.mxu1 }
 0x326   : > { %v1002_v2 = vpop.f32.mrf.mxu1 }
 0x327   : > { %v2894_v4 = vadd.f32 %v1002_v2, %v928_v62 }
 0x328   : > { %v1004_v5 = vpop.f32.mrf.mxu1 }
 0x329   : > { %v2896_v7 = vadd.f32 %v1004_v5, %v930_v1 }
 0x32a   : > { %v1079_v8 = vpop.f32.mrf.mxu1 }
 0x32b   : > { %2461 = vmatmul.mubr.msk.f32.vlgmr.msra.gmra.mxu0 %vm858_vm8, %v1079_v8  ;;  %v1008_v8 = vmul.f32 0.5, %v2896_v7 }
 0x32c   : > { %1408 = vmatpush1.xpose.msra.mxu0 %v2781_v45  ;;  %v1081_v9 = vpop.f32.mrf.mxu1  ;;  %1441 = vmatprep.mubr.f32.mxu0 %v1306_v58 }
 0x32d   : > { %1554 = vmatprep.subr.mxu0 %v2787_v49 }
 0x32e   : > { %v2901_v10 = vpop.f32.mrf.mxu1 }
 0x32f   : > { %1442 = vmatmul.mubr.f32.vlgmr.msra.gmra.mxu0 %v1305_v57 }
 0x330   : > { %1555 = vmatpush1.msra.mxu0 %v2781_v45  ;;  %v2904_v11 = vpop.f32.mrf.mxu1  ;;  %1588 = vmatprep.mubr.f32.mxu0 %v2599_v0 }
 0x331   : > { %1701 = vmatprep.subr.mxu0 %v2759_v27 }
 0x332   : > { %v1373_v12 = vpop.f32.mrf.mxu1 }
 0x333   : > { %2463 = vmatmul.mubr.msk.f32.vlgmr.msra.gmra.mxu0 %vm858_vm8, %v1373_v12 }
 0x334   : > { %1702 = vmatpush1.xpose.msra.mxu0 %v2752_v22  ;;  %v1375_v14 = vpop.f32.mrf.mxu1  ;;  %1735 = vmatprep.mubr.f32.mxu0 %v1600_v13 }
 0x335   : > { %1848 = vmatprep.subr.mxu0 %v2759_v27  ;;  %v1010_v14 = vmul.f32 %v1008_v8, %v2832_v51 }
 0x337   : > { %1736 = vmatmul.mubr.f32.vlgmr.msra.gmra.mxu0 %v1599_v15 }
 0x338   : > { %1849 = vmatpush1.msra.mxu0 %v2752_v22  ;;  %1882 = vmatprep.mubr.f32.mxu0 %v2599_v0 }
 0x339   : > { %1995 = vmatprep.subr.mxu0 %v2787_v49 }
 0x3eb   : > { %v1296_v16 = vpop.f32.mrf.mxu0 }
 0x3ec   : > { %v1297_v60 = vadd.f32 %v1296_v16, %v2901_v10  ;;  %v1007_v10 = vmul.f32 0.5, %v2894_v4 }
 0x3ed   : > { %v1298_v17 = vpop.f32.mrf.mxu0 }
 0x3ee   : > { %v1299_v63 = vadd.f32 %v1298_v17, %v2904_v11  ;;  %v1301_v2 = vmul.f32 0.5, %v1297_v60 }
 0x3ef   : > { %v1443_v20 = vpop.f32.mrf.mxu0 }
 0x3f0   : > { %2462 = vmatmul.mubr.msk.f32.vlgmr.msra.gmra.mxu1 %vm858_vm8, %v1443_v20  ;;  %v1302_v62 = vmul.f32 0.5, %v1299_v63 }
 0x3f1   : > { %1632 = vmatpush1.xpose.msra.mxu1 %v2772_v34  ;;  %v1445_v21 = vpop.f32.mrf.mxu0  ;;  %1665 = vmatprep.mubr.f32.mxu1 %v1600_v13  ;;  %v1303_v13 = vmul.f32 %v1301_v2, %v2842_v55 }
 0x3f2   : > { %1774 = vmatprep.subr.mxu1 %v2774_v35  ;;  %v1304_v12 = vmul.f32 %v1302_v62, %v2846_v56 }
 0x3f3   : > { %v1590_v27 = vpop.f32.mrf.mxu0 }
 0x3f4   : > { %1666 = vmatmul.mubr.f32.vlgmr.msra.gmra.mxu1 %v1599_v15  ;;  %v1009_v15 = vmul.f32 %v1007_v10, %v2829_v46  ;;  %v229_v46 = vld [vmem:[%s3004_s3] sm:$0xf] }
 0x3f5   : > { %1775 = vmatpush1.msra.mxu1 %v2772_v34  ;;  %v1592_v22 = vpop.f32.mrf.mxu0  ;;  %1808 = vmatprep.mubr.f32.mxu1 %v2599_v0  ;;  %v1893_v34 = vmul.f32 %v2884_v61, %v2822_v42 }
 0x3f6   : > { %1925 = vmatprep.subr.mxu1 %v2785_v48 }
 0x3f7   : > { %v1737_v23 = vpop.f32.mrf.mxu0 }
 0x3f8   : > { %2464 = vmatmul.mubr.msk.f32.vlgmr.msra.gmra.mxu1 %vm858_vm8, %v1737_v23 }
 0x3f9   : > { %1926 = vmatpush1.xpose.msra.mxu1 %v2783_v47  ;;  %v1739_v29 = vpop.f32.mrf.mxu0  ;;  %1959 = vmatprep.mubr.f32.mxu1 %v1894_v24 }
 0x3fa   : > { %2068 = vmatprep.subr.mxu1 %v2785_v48 }
 0x3fc   : > { %1960 = vmatmul.mubr.f32.vlgmr.msra.gmra.mxu1 %v1893_v34 }
 0x3fd   : > { %2069 = vmatpush1.msra.mxu1 %v2783_v47  ;;  %2102 = vmatprep.mubr.f32.mxu1 %v2599_v0 }
 0x4b0   : > { %v1516_v35 = vpop.f32.mrf.mxu1 }
 0x4b1   : > { %v1591_v54 = vadd.f32 %v1590_v27, %v1516_v35 }
 0x4b2   : > { %v1518_v30 = vpop.f32.mrf.mxu1 }
 0x4b3   : > { %v1593_v53 = vadd.f32 %v1592_v22, %v1518_v30  ;;  %v1595_v26 = vmul.f32 0.5, %v1591_v54 }
 0x4b4   : > { %v1667_v31 = vpop.f32.mrf.mxu1 }
 0x4b5   : > { %2465 = vmatmul.mubr.msk.f32.vlgmr.msra.gmra.mxu0 %vm858_vm8, %v1667_v31  ;;  %v1596_v58 = vmul.f32 0.5, %v1593_v53  ;;  %v1597_v11 = vmul.f32 %v1595_v26, %v2884_v61 }
 0x4b6   : > { %1996 = vmatpush1.xpose.msra.mxu0 %v2781_v45  ;;  %v1669_v44 = vpop.f32.mrf.mxu1  ;;  %2029 = vmatprep.mubr.f32.mxu0 %v1894_v24 }
 0x4b7   : > { %2142 = vmatprep.subr.mxu0 %v2787_v49  ;;  %v1598_v9 = vmul.f32 %v1596_v58, %v2877_v25 }
 0x4b8   : > { %v1810_v48 = vpop.f32.mrf.mxu1 }
 0x4b9   : > { %2030 = vmatmul.mubr.f32.vlgmr.msra.gmra.mxu0 %v1893_v34 }
 0x4ba   : > { %2143 = vmatpush1.msra.mxu0 %v2781_v45  ;;  %v1812_v42 = vpop.f32.mrf.mxu1  ;;  %2176 = vmatprep.mubr.f32.mxu0 %v2599_v0 }
 0x4bc   : > { %v1961_v47 = vpop.f32.mrf.mxu1 }
 0x4bd   : > { %2467 = vmatmul.mubr.msk.f32.vlgmr.msra.gmra.mxu0 %vm858_vm8, %v1961_v47 }
 0x4be   : > { %v1963_v33 = vpop.f32.mrf.mxu1  ;;  %2342 = vmatprep.mubr.f32.mxu0 %v2599_v0 }
 0x575   : > { %v1884_v36 = vpop.f32.mrf.mxu0 }
 0x576   : > { %v1885_v43 = vadd.f32 %v1884_v36, %v1810_v48 }
 0x577   : > { %v1886_v37 = vpop.f32.mrf.mxu0 }
 0x578   : > { %v1887_v45 = vadd.f32 %v1886_v37, %v1812_v42  ;;  %v1889_v19 = vmul.f32 0.5, %v1885_v43 }
 0x579   : > { %v2031_v38 = vpop.f32.mrf.mxu0 }
 0x57a   : > { %2466 = vmatmul.mubr.msk.f32.vlgmr.msra.gmra.mxu1 %vm858_vm8, %v2031_v38  ;;  %v1890_v18 = vmul.f32 0.5, %v1887_v45  ;;  %v1891_v5 = vmul.f32 %v1889_v19, %v2842_v55 }
 0x57b   : > { %v2033_v39 = vpop.f32.mrf.mxu0  ;;  %2260 = vmatprep.mubr.f32.mxu1 %v2599_v0 }
 0x57c   : > { %v1892_v1 = vmul.f32 %v1890_v18, %v2846_v56 }
 0x57d   : > { %v2178_v49 = vpop.f32.mrf.mxu0 }
 0x57f   : > { %v2180_v50 = vpop.f32.mrf.mxu0 }
 0x63a   : > { %v2104_v40 = vpop.f32.mrf.mxu1 }
 0x63b   : > { %v2179_v41 = vadd.f32 %v2178_v49, %v2104_v40 }
 0x63c   : > { %v2106_v52 = vpop.f32.mrf.mxu1 }
 0x63d   : > { %v2181_v28 = vadd.f32 %v2180_v50, %v2106_v52  ;;  %v2183_v32 = vmul.f32 0.5, %v2179_v41 }
 0x63f   : > { %v2184_v59 = vmul.f32 0.5, %v2181_v28  ;;  %v2185_v57 = vmul.f32 %v2183_v32, %v2884_v61  ;;  %v2190_v61 = vpop.permute.xlu0 %2189 }
 0x640   : > { %v2267_v51 = vrot.slane %v2190_v61, 4 }
 0x641   : > { %v2186_v0 = vmul.f32 %v2184_v59, %v2877_v25  ;;  %v228_v25 = vld [vmem:[%s3003_s2] sm:$0xf] }
 0x643   : > { %2218 = vmatprep.subr.mxu1 %v2186_v0 }
 0x644   : > { %2219 = vmatpush1.msra.mxu1 %v2185_v57 }
 0x645   : > { %2220 = vmatprep.subr.mxu1 %v1892_v1 }
 0x646   : > { %2221 = vmatpush1.msra.mxu1 %v1891_v5 }
 0x647   : > { %2222 = vmatprep.subr.mxu1 %v1598_v9 }
 0x648   : > { %2223 = vmatpush1.msra.mxu1 %v1597_v11 }
 0x649   : > { %2224 = vmatprep.subr.mxu1 %v1304_v12 }
 0x64a   : > { %2225 = vmatpush1.msra.mxu1 %v1303_v13 }
 0x64b   : > { %2226 = vmatprep.subr.mxu1 %v1010_v14 }
 0x64c   : > { %2227 = vmatpush1.msra.mxu1 %v1009_v15 }
 0x64d   : > { %2468 = vmatmul.mubr.msk.f32.vlgmr.msra.gmra.mxu1 %vm2192_vm9, %v228_v25 }
 0x70d   : > { %v2262_v56 = vpop.f32.mrf.mxu1 }
 0x70e   : > { %v2263_v7 = vadd.f32 %v2262_v56, %v2190_v61 }
 0x70f   : > { %v2264_v55 = vpop.f32.mrf.mxu1 }
 0x710   : > { %v2265_v4 = vadd.f32 %v2264_v55, %v2190_v61 }
 0x712   : > { %2469 = vmatprep.subr.msk.mxu0 %vm259_vm0, %v2265_v4 }
 0x713   : > { %2470 = vmatpush1.msk.msra.mxu0 %vm259_vm0, %v2263_v7 }
 0x714   : > { %2471 = vmatmul.mubr.msk.f32.vlgmr.msra.gmra.mxu0 %vm243_vm1, %v229_v46 }
 0x7d4   : > { %v2344_v16 = vpop.f32.mrf.mxu0 }
 0x7d5   : > { %v2345_v17 = vadd.f32 %v2344_v16, %v2267_v51 }
 0x7d6   : > { %v2346_v20 = vpop.f32.mrf.mxu0 }
 0x7d7   : > { %v2347_v21 = vadd.f32 %v2346_v20, %v2267_v51  ;;  %v2350_v27 = vadd.f32 %v2345_v17, %v2690_v3 }
 0x7d9   : > { %v2351_v22 = vadd.f32 %v2347_v21, %v2694_v6 }
 0x7db   : > { %v2354_v23 = vcombine.low %v2350_v27, %v2351_v22 }
 0x7dd   : > { %2356 = vst [vmem:[%s217_s25] sm:$0xff] %v2354_v23 }
 0x7de   : > { %2550 = shalt.err (!%p2547_p3)
}
 0x7df   : > { %s2551_s12 = scalar_lea.hbm %s2370_s7, 128  ;;  %s2555_s15 = scalar_lea.hbm %s3006_s5, 256 }
 0x7e0   : > { %p2552_p4 = scmp.ne.s32.totalorder %s2370_s7, %s2551_s12  ;;  %p2556_p9 = scmp.lt.s32.totalorder %s2370_s7, %s3006_s5 }
 0x7e1   : > { %p2557_p10 = scmp.lt.s32.totalorder %s2555_s15, %s2551_s12 }
 0x7e2   : > { %p2553_p7 = pnand %p2552_p4, %p2670_p5 }
 0x7e3   : > { %p2558_p11 = por %p2557_p10, %p2556_p9 }
 0x7e4   : > { %p2554_p8 = pneg %p2553_p7 }
 0x7e6   : > { %p2559_p12 = pnand %p2558_p11, %p2554_p8 }
 0x7e8   : > { %2562 = shalt.err (!%p2559_p12)
}
 0x7e9   : > { %2479 = dma.vmem_to_hbm [thread:$0]  (%p2670_p5), %s2373_s26, 128, %s2370_s7, %s2358_s8  }
 0x7ea PF: > { %p2485_p13 = scmp.ge.s32.totalorder %s2597_s21, 2  ;;  %s2384_s23 = sand.u32 1, %s2585_s18  }
 0x7eb   : > { %s2385_s25 = scalar_lea.sflag [#allocation3], %s2384_s23 }
 0x7ec   : > { %p2482_p0 = pnand %p2485_p13, %p2674_p6 }
 0x7ee   : > { %p2483_p1 = pneg %p2482_p0 }
 0x7f0   : > { %2580 = dma.done.wait (%p2483_p1), %s2385_s25, 128  }
 0x7f1   : > { %2582 = vsyncadd (%p2483_p1), %s2385_s25, 4294967168  ;;  %p15_p2 = scmp.ge.s32.totalorder %s2657_s24, 4   ;;  %s3009_s18 = smov %s2589_s19 }
 0x7f2   : > { %s3010_s19 = smov %s2593_s20  ;;  %s3011_s20 = smov %s2668_s27 }
 0x7f3   : > { %s3012_s21 = smov %s2657_s24  ;;  %17 = sbr.rel (!%p15_p2) target bundleno = 3 (0x3), region = 75 }
 0x7f8   :  { %2390 = vsyncpa [#allocation3], 1 }
 0x7f9   :  { %2392 = vsyncpa [#allocation3 + $0x1], 1 }

</bundles_post_ra>
